<compile_context>
chip_gen: v6e
topology: v6e:2x2x1
jax: 0.10.0
libtpu: 0.0.40
codegen_flags: <defaults>
</compile_context>

<pallas_src>
import functools

import jax
import jax.numpy as jnp
from jax.experimental import pallas as pl
from jax.experimental.pallas import tpu as pltpu

_NUM_PARTS = 2   # megacore: independent parallel partitions of the spatial axis
_LANE = 128


def _dice_reduce_kernel(pred_ref, label_ref, inter_ref, union_ref):
    # pred_ref:  (1, C, St)  input dtype (f32 / bf16), one batch row, one tile
    # label_ref: (1, 1, St)  int32 class labels (-1 in the padded tail)
    # inter_ref: (1, 1, C)   f32 accumulator: sum(pred * onehot)
    # union_ref: (1, 1, C)   f32 accumulator: sum(pred^2) + sum(onehot)
    s = pl.program_id(2)

    @pl.when(s == 0)
    def _():
        inter_ref[...] = jnp.zeros_like(inter_ref)
        union_ref[...] = jnp.zeros_like(union_ref)

    pred = pred_ref[...].astype(jnp.float32)     # cast in VMEM (free VPU slot)
    labels = label_ref[...]                      # (1, 1, St) int32

    # one-hot built on the fly; where() avoids materializing an f32 mask and
    # the extra multiply.  Padded labels (-1) never match -> contribute 0.
    class_ids = jax.lax.broadcasted_iota(jnp.int32, pred.shape, 1)  # (1, C, St)
    eq = class_ids == labels                                        # (1, C, St)

    inter_elem = jnp.where(eq, pred, 0.0)
    union_elem = pred * pred + jnp.where(eq, 1.0, 0.0)   # sum(mask^2)==sum(mask)

    inter_tile = jnp.sum(inter_elem, axis=-1)            # (1, C)
    union_tile = jnp.sum(union_elem, axis=-1)            # (1, C)

    # TODO(synk): the per-step sublane->lane relayout + narrow (1,1,C) store
    # could be hoisted behind pl.when(s == last) with a (C, 1) VMEM scratch,
    # but with 8K-lane tiles it is already amortized to a few % of the step.
    inter_ref[...] += inter_tile[:, None, :]
    union_ref[...] += union_tile[:, None, :]


@functools.partial(jax.jit, static_argnames=("num_class", "s_tile_target"))
def dice_loss(y_pred, y_true, *, num_class=36, s_tile_target=8192):
    """Pallas implementation of DiceLoss.forward.

    y_pred: (B, C, D, H, W) float (f32 or bf16) with C == num_class
    y_true: (B, 1, D, H, W) integer class labels in [0, num_class)
    """
    B, C, D, H, W = y_pred.shape
    assert C == num_class
    S = D * H * W

    # Tile choice: big lane-dense tiles (HBM roofline), but capped so that
    # ~3 in-flight f32 copies of a (1, C, s_tile) block stay under ~12 MiB
    # (v5e's default scoped-VMEM limit is 16 MiB).
    itemsize = max(jnp.dtype(y_pred.dtype).itemsize, 4)
    vmem_cap = (12 * 1024 * 1024) // (3 * C * itemsize)
    vmem_cap = max(_LANE, (vmem_cap // _LANE) * _LANE)
    s_tile = min(s_tile_target, vmem_cap, pl.cdiv(S, _NUM_PARTS * _LANE) * _LANE)
    s_tile = max(s_tile, _LANE)

    tiles_per_part = pl.cdiv(S, _NUM_PARTS * s_tile)
    s_pad = _NUM_PARTS * s_tile * tiles_per_part

    pred = y_pred.reshape(B, C, S)                      # native dtype, cast in-kernel
    labels = y_true.reshape(B, 1, S).astype(jnp.int32)
    if s_pad != S:
        pad = s_pad - S
        # pred padded with 0 (adds nothing to inter / pred^2); labels padded
        # with -1 (outside [0, C) -> one-hot row is all zeros).
        pred = jnp.pad(pred, ((0, 0), (0, 0), (0, pad)))
        labels = jnp.pad(labels, ((0, 0), (0, 0), (0, pad)), constant_values=-1)

    grid = (B, _NUM_PARTS, tiles_per_part)

    def data_map(b, p, s):
        return (b, 0, p * tiles_per_part + s)

    def out_map(b, p, s):
        # flatten (batch, partition) into the leading output axis so the block
        # keeps the known-good (1, 1, C) shape (last two dims == full dims)
        return (b * _NUM_PARTS + p, 0, 0)

    inter, union = pl.pallas_call(
        _dice_reduce_kernel,
        out_shape=(
            jax.ShapeDtypeStruct((B * _NUM_PARTS, 1, C), jnp.float32),
            jax.ShapeDtypeStruct((B * _NUM_PARTS, 1, C), jnp.float32),
        ),
        grid_spec=pltpu.PrefetchScalarGridSpec(
            num_scalar_prefetch=0,
            grid=grid,
            in_specs=[
                pl.BlockSpec((1, C, s_tile), data_map),
                pl.BlockSpec((1, 1, s_tile), data_map),
            ],
            out_specs=[
                pl.BlockSpec((1, 1, C), out_map),
                pl.BlockSpec((1, 1, C), out_map),
            ],
        ),
        compiler_params=pltpu.CompilerParams(
            dimension_semantics=("parallel", "parallel", "arbitrary")
        ),
    )(pred, labels)

    # combine the two megacore partitions, then the tiny scalar epilogue
    inter = inter[:, 0, :].reshape(B, _NUM_PARTS, C).sum(axis=1)   # (B, C)
    union = union[:, 0, :].reshape(B, _NUM_PARTS, C).sum(axis=1)   # (B, C)

    dsc = 2.0 * inter / (union + 1e-05)
    return 1.0 - jnp.mean(dsc)


def _dice_loss_ref(y_pred, y_true, num_class=36):
    """Pure-JAX reference mirroring the PyTorch module exactly."""
    oh = jax.nn.one_hot(y_true, num_class)                       # (B,1,D,H,W,C)
    oh = jnp.squeeze(oh, 1)                                      # (B,D,H,W,C)
    oh = jnp.transpose(oh, (0, 4, 1, 2, 3)).astype(jnp.float32)  # (B,C,D,H,W)
    inter = jnp.sum(y_pred * oh, axis=(2, 3, 4))
    union = jnp.sum(y_pred ** 2, axis=(2, 3, 4)) + jnp.sum(oh ** 2, axis=(2, 3, 4))
    dsc = 2.0 * inter / (union + 1e-05)
    return 1.0 - jnp.mean(dsc)


if __name__ == "__main__":
    key = jax.random.PRNGKey(0)

    # --- test 1: f32, spatial size already a multiple of the tile ---
    B, C, D, H, W = 2, 36, 4, 8, 8
    k1, k2, k3, k4 = jax.random.split(key, 4)
    y_pred = jax.random.uniform(k1, (B, C, D, H, W), dtype=jnp.float32)
    y_true = jax.random.randint(k2, (B, 1, D, H, W), 0, C, dtype=jnp.int32)

    loss = jax.block_until_ready(dice_loss(y_pred, y_true, num_class=C))
    ref = _dice_loss_ref(y_pred, y_true, num_class=C)
    assert jnp.allclose(loss, ref, atol=1e-5, rtol=1e-5), (loss, ref)

    # --- test 2: bf16 pred + ragged spatial size (exercises padding path) ---
    D2, H2, W2 = 3, 7, 5
    y_pred2 = jax.random.uniform(k3, (B, C, D2, H2, W2), dtype=jnp.float32)
    y_pred2_bf16 = y_pred2.astype(jnp.bfloat16)
    y_true2 = jax.random.randint(k4, (B, 1, D2, H2, W2), 0, C, dtype=jnp.int32)

    loss2 = jax.block_until_ready(dice_loss(y_pred2_bf16, y_true2, num_class=C))
    ref2 = _dice_loss_ref(y_pred2_bf16.astype(jnp.float32), y_true2, num_class=C)
    assert jnp.allclose(loss2, ref2, atol=1e-5, rtol=1e-5), (loss2, ref2)

    print("KERNEL_OK")
</pallas_src>

<mosaic_0001>
module attributes {stable_mosaic.version = 11 : i64} {
  func.func @_dice_reduce_kernel(%arg0: i32, %arg1: i32, %arg2: i32, %arg3: memref<1x36x128xf32, #tpu.memory_space<vmem>>, %arg4: memref<1x1x128xi32, #tpu.memory_space<vmem>>, %arg5: memref<1x1x36xf32, #tpu.memory_space<vmem>>, %arg6: memref<1x1x36xf32, #tpu.memory_space<vmem>>) attributes {dimension_semantics = [#tpu.dimension_semantics<parallel>, #tpu.dimension_semantics<parallel>, #tpu.dimension_semantics<arbitrary>], iteration_bounds = array<i64: 2, 2, 1>, scalar_prefetch = 0 : i64, scratch_operands = 0 : i64, tpu.core_type = #tpu.core_type<tc>, window_params = [{transform_indices = @transform_0, window_bounds = array<i64: 1, 36, 128>}, {transform_indices = @transform_1, window_bounds = array<i64: 1, 1, 128>}, {transform_indices = @transform_2, window_bounds = array<i64: 1, 1, 36>}, {transform_indices = @transform_3, window_bounds = array<i64: 1, 1, 36>}]} {
    %c0_i32 = arith.constant 0 : i32
    %0 = arith.cmpi eq, %arg2, %c0_i32 : i32
    %1 = arith.extui %0 : i1 to i32
    %c0_i32_0 = arith.constant 0 : i32
    %2 = arith.cmpi ne, %1, %c0_i32_0 : i32
    scf.if %2 {
      %cst_22 = arith.constant 0.000000e+00 : f32
      %25 = vector.broadcast %cst_22 : f32 to vector<1x1x36xf32>
      %c0_23 = arith.constant 0 : index
      %c0_24 = arith.constant 0 : index
      %c0_25 = arith.constant 0 : index
      %26 = vector.load %arg5[%c0_23, %c0_24, %c0_25] : memref<1x1x36xf32, #tpu.memory_space<vmem>>, vector<1x1x36xf32>
      tpu.vector_store %arg5[%c0_23, %c0_24, %c0_25], %25 {strides = array<i32>} : memref<1x1x36xf32, #tpu.memory_space<vmem>>, vector<1x1x36xf32>,
      %cst_26 = arith.constant 0.000000e+00 : f32
      %27 = vector.broadcast %cst_26 : f32 to vector<1x1x36xf32>
      %c0_27 = arith.constant 0 : index
      %c0_28 = arith.constant 0 : index
      %c0_29 = arith.constant 0 : index
      %28 = vector.load %arg6[%c0_27, %c0_28, %c0_29] : memref<1x1x36xf32, #tpu.memory_space<vmem>>, vector<1x1x36xf32>
      tpu.vector_store %arg6[%c0_27, %c0_28, %c0_29], %27 {strides = array<i32>} : memref<1x1x36xf32, #tpu.memory_space<vmem>>, vector<1x1x36xf32>,
    } else {
    }
    %c0 = arith.constant 0 : index
    %c0_1 = arith.constant 0 : index
    %c0_2 = arith.constant 0 : index
    %3 = vector.load %arg3[%c0, %c0_1, %c0_2] : memref<1x36x128xf32, #tpu.memory_space<vmem>>, vector<1x36x128xf32>
    %c0_3 = arith.constant 0 : index
    %c0_4 = arith.constant 0 : index
    %c0_5 = arith.constant 0 : index
    %4 = vector.load %arg4[%c0_3, %c0_4, %c0_5] : memref<1x1x128xi32, #tpu.memory_space<vmem>>, vector<1x1x128xi32>
    %5 = tpu.iota {dimensions = array<i32: 1>} : vector<1x36x128xi32>
    %6 = vector.broadcast %4 : vector<1x1x128xi32> to vector<1x36x128xi32>
    %7 = arith.cmpi eq, %5, %6 : vector<1x36x128xi32>
    %cst = arith.constant 0.000000e+00 : f32
    %8 = vector.broadcast %cst : f32 to vector<1x36x128xf32>
    %9 = arith.select %7, %3, %8 : vector<1x36x128xi1>, vector<1x36x128xf32>
    %10 = arith.mulf %3, %3 : vector<1x36x128xf32>
    %cst_6 = arith.constant 1.000000e+00 : f32
    %cst_7 = arith.constant 0.000000e+00 : f32
    %11 = vector.broadcast %cst_6 : f32 to vector<1x36x128xf32>
    %12 = vector.broadcast %cst_7 : f32 to vector<1x36x128xf32>
    %13 = arith.select %7, %11, %12 : vector<1x36x128xi1>, vector<1x36x128xf32>
    %14 = arith.addf %10, %13 : vector<1x36x128xf32>
    %cst_8 = arith.constant dense<0.000000e+00> : vector<1x36xf32>
    %15 = vector.multi_reduction <add>, %9, %cst_8 [2] : vector<1x36x128xf32> to vector<1x36xf32>
    %cst_9 = arith.constant dense<0.000000e+00> : vector<1x36xf32>
    %16 = vector.multi_reduction <add>, %14, %cst_9 [2] : vector<1x36x128xf32> to vector<1x36xf32>
    %c0_10 = arith.constant 0 : index
    %c0_11 = arith.constant 0 : index
    %c0_12 = arith.constant 0 : index
    %17 = vector.load %arg5[%c0_10, %c0_11, %c0_12] : memref<1x1x36xf32, #tpu.memory_space<vmem>>, vector<1x1x36xf32>
    %18 = vector.shape_cast %15 : vector<1x36xf32> to vector<1x1x36xf32>
    %19 = arith.addf %17, %18 : vector<1x1x36xf32>
    %c0_13 = arith.constant 0 : index
    %c0_14 = arith.constant 0 : index
    %c0_15 = arith.constant 0 : index
    %20 = vector.load %arg5[%c0_13, %c0_14, %c0_15] : memref<1x1x36xf32, #tpu.memory_space<vmem>>, vector<1x1x36xf32>
    tpu.vector_store %arg5[%c0_13, %c0_14, %c0_15], %19 {strides = array<i32>} : memref<1x1x36xf32, #tpu.memory_space<vmem>>, vector<1x1x36xf32>,
    %c0_16 = arith.constant 0 : index
    %c0_17 = arith.constant 0 : index
    %c0_18 = arith.constant 0 : index
    %21 = vector.load %arg6[%c0_16, %c0_17, %c0_18] : memref<1x1x36xf32, #tpu.memory_space<vmem>>, vector<1x1x36xf32>
    %22 = vector.shape_cast %16 : vector<1x36xf32> to vector<1x1x36xf32>
    %23 = arith.addf %21, %22 : vector<1x1x36xf32>
    %c0_19 = arith.constant 0 : index
    %c0_20 = arith.constant 0 : index
    %c0_21 = arith.constant 0 : index
    %24 = vector.load %arg6[%c0_19, %c0_20, %c0_21] : memref<1x1x36xf32, #tpu.memory_space<vmem>>, vector<1x1x36xf32>
    tpu.vector_store %arg6[%c0_19, %c0_20, %c0_21], %23 {strides = array<i32>} : memref<1x1x36xf32, #tpu.memory_space<vmem>>, vector<1x1x36xf32>,
    return
  }
  func.func @transform_0(%arg0: i32, %arg1: i32, %arg2: i32) -> (i32, i32, i32) {
    %c1_i32 = arith.constant 1 : i32
    %0 = arith.muli %arg1, %c1_i32 : i32
    %1 = arith.addi %0, %arg2 : i32
    %c0_i32 = arith.constant 0 : i32
    %c0_i32_0 = arith.constant 0 : i32
    return %arg0, %c0_i32, %1 : i32, i32, i32
  }
  func.func @transform_1(%arg0: i32, %arg1: i32, %arg2: i32) -> (i32, i32, i32) {
    %c1_i32 = arith.constant 1 : i32
    %0 = arith.muli %arg1, %c1_i32 : i32
    %1 = arith.addi %0, %arg2 : i32
    %c0_i32 = arith.constant 0 : i32
    %c0_i32_0 = arith.constant 0 : i32
    return %arg0, %c0_i32, %1 : i32, i32, i32
  }
  func.func @transform_2(%arg0: i32, %arg1: i32, %arg2: i32) -> (i32, i32, i32) {
    %c2_i32 = arith.constant 2 : i32
    %0 = arith.muli %arg0, %c2_i32 : i32
    %1 = arith.addi %0, %arg1 : i32
    %c0_i32 = arith.constant 0 : i32
    %c0_i32_0 = arith.constant 0 : i32
    %c0_i32_1 = arith.constant 0 : i32
    return %1, %c0_i32, %c0_i32_0 : i32, i32, i32
  }
  func.func @transform_3(%arg0: i32, %arg1: i32, %arg2: i32) -> (i32, i32, i32) {
    %c2_i32 = arith.constant 2 : i32
    %0 = arith.muli %arg0, %c2_i32 : i32
    %1 = arith.addi %0, %arg1 : i32
    %c0_i32 = arith.constant 0 : i32
    %c0_i32_0 = arith.constant 0 : i32
    %c0_i32_1 = arith.constant 0 : i32
    return %1, %c0_i32, %c0_i32_0 : i32, i32, i32
  }
}

</mosaic_0001>

<bundles_post_ra>
// kernel: dice_loss.1
= control target key start
LH: loop header
LB: loop body
LE: loop exit
PB: predicated region body
PF: predicated region fallthrough
CT: control target
= control target key end

     0   :  { %s1525_s12 = smov 0   ;;  %s1527_s13 = smov 0   ;;  %s1865_s0 = inlined_call_operand.vmem [shape: f32[2,36,256], index: 0, kind: input, shape index: {}]   ;;  %s1866_s1 = inlined_call_operand.vmem [shape: s32[2,1,256], index: 1, kind: input, shape index: {}]   ;;  %s1867_s2 = inlined_call_operand.vmem [shape: f32[4,1,36], index: 2, kind: output, shape index: {0}]   ;;  %s1868_s3 = inlined_call_operand.vmem [shape: f32[4,1,36], index: 3, kind: output, shape index: {1}]  }
   0x1   :  { %s1529_s14 = smov 0   ;;  %s1531_s15 = smov 0  }
   0x2   :  { %s1533_s16 = smov 0   ;;  %s1535_s17 = smov 0  }
   0x3   :  { %s1537_s18 = smov 0  }
   0x4 LB: > { %s29_s19 = sadd.s32 1, %s1492_s16  ;;  %s33_s20 = sadd.s32 1, %s1496_s17  ;;  %s1500_s18 = sphi %s1537_s18, %s14_s18   ;;  %s1496_s17 = sphi %s1535_s17, %s1874_s17   ;;  %s1492_s16 = sphi %s1533_s16, %s1873_s16   ;;  %s1488_s15 = sphi %s1531_s15, %s1872_s15   ;;  %s1484_s14 = sphi %s1529_s14, %s1871_s14   ;;  %s1480_s13 = sphi %s1527_s13, %s1870_s13   ;;  %s1476_s12 = sphi %s1525_s12, %s1869_s12  }
   0x5   : > { %p31_p0 = scmp.ge.s32.totalorder %s29_s19, 2  ;;  %p51_p1 = scmp.ne.s32.totalorder %s1480_s13, %s1476_s12 }
   0x6   : > { %p52_p2 = scmp.eq.s32.totalorder %s1500_s18, 0  ;;  %s44_s24 = sadd.s32 1, %s1480_s13 }
   0x7   : > { %s1876_s19 = smov (%p31_p0, %s29_s19), 0  ;;  %s1878_s20 = smov (!%p31_p0, %s33_s20), %s1496_s17 }
   0x8   : > { %p53_p3 = por %p52_p2, %p51_p1  ;;  %p35_p4 = scmp.ge.s32.totalorder %s1878_s20, 2 }
   0x9   : > { %s40_s21 = ssub.s32 %s1492_s16, %s1876_s19  ;;  %p1373_p6 = scmp.ge.s32.totalorder %s1500_s18, 4 }
   0xa   : > { %s1880_s20 = smov (%p35_p4, %s1878_s20), 0 }
   0xb   : > { %s39_s22 = ssub.s32 %s1496_s17, %s1880_s20  ;;  %167 = sbr.rel (%p1373_p6) target bundleno = 26 (0x1a), region = 16 }
   0xc   : > { %s41_s23 = sor.u32 %s40_s21, %s39_s22 }
   0xd   : > { %p42_p5 = scmp.eq.s32.totalorder %s41_s23, 0 }
   0xf   : > { %s1576_s25 = scalar_select %p42_p5, %s1480_s13, %s44_s24  }
  0x10   : > { %170 = sbr.rel (!%p53_p3) target bundleno = 26 (0x1a), region = 20  ;;  %s172_s26 = sand.u32 (%p53_p3), 1, %s1480_s13  }
  0x11   : > { %s1383_s27 = smul.u32 (%p53_p3), 10, %s1496_s17 }
  0x12   : > { %s1382_s28 = smul.u32 (%p53_p3), 40, %s172_s26 }
  0x13   : > { %s177_s29 = sadd.s32 (%p53_p3), %s1492_s16, %s1383_s27 }
  0x14   : > { %s1374_s30 = sshll.u32 (%p53_p3), %s177_s29, 3  ;;  %s174_s7 = scalar_lea.vmem (%p53_p3), [#allocation2], %s1382_s28 }
  0x15   : > { %s179_s6 = scalar_lea.vmem %s1865_s0, %s1374_s30 }
  0x16   : > { %v216_v0 = vld [vmem:[%s179_s6] sm:$0xff]  ;;  %v218_v1 = vld [vmem:[%s179_s6 + $0x10] sm:$0xff] }
  0x17   : > { %v220_v2 = vld [vmem:[%s179_s6 + $0x20] sm:$0xff]  ;;  %217 = vst [vmem:[%s174_s7] sm:$0xff] %v216_v0  ;;  %219 = vst [vmem:[%s174_s7 + $0x8] sm:$0xff] %v218_v1  ;;  %v222_v3 = vld [vmem:[%s179_s6 + $0x30] sm:$0xff] }
  0x18   : > { %221 = vst [vmem:[%s174_s7 + $0x10] sm:$0xff] %v220_v2  ;;  %v224_v4 = vld [vmem:[%s179_s6 + $0x40] sm:$0xff]  ;;  %223 = vst [vmem:[%s174_s7 + $0x18] sm:$0xff] %v222_v3 }
  0x19   : > { %225 = vst [vmem:[%s174_s7 + $0x20] sm:$0xff] %v224_v4 }
  0x1a PF: > { %p1375_p7 = scmp.ge.s32.totalorder %s1500_s18, 1  ;;  %p242_p8 = scmp.lt.s32.totalorder %s1500_s18, 5 }
  0x1c   : > { %p243_p9 = pnand %p1375_p7, %p242_p8 }
  0x1d   : > { %s249_s8 = sand.u32 (!%p243_p9), 1, %s1476_s12   ;;  %p287_p10 = scmp.lt.s32.totalorder (!%p243_p9), %s1488_s15, 1 }
  0x1e   : > { %246 = sbr.rel (%p243_p9) target bundleno = 373 (0x175), region = 62  ;;  %p289_p11 = scmp.lt.s32.totalorder (!%p243_p9), %s1484_s14, 1 }
  0x1f   : > { %s1384_s9 = smul.u32 (!%p243_p9), 40, %s249_s8  ;;  %s1377_s12 = sshll.u32 (!%p243_p9), %s1488_s15, 1 }
  0x20   : > { %s296_s28 = sadd.s32 (!%p243_p9), %s1484_s14, %s1377_s12 }
  0x21   : > { %s251_s27 = scalar_lea.vmem (!%p243_p9), [#allocation2], %s1384_s9  ;;  %p297_p12 = scmp.lt.s32.totalorder (!%p243_p9), %s296_s28, 3 }
  0x23   : > { %v322_v5 = vlaneseq  ;;  %s288_s10 = scalar_select %p287_p10, %s1488_s15, 1  ;;  %v316_v8 = vld [vmem:[%s251_s27] sm:$0xff]  ;;  %v317_v11 = vld [vmem:[%s251_s27 + $0x8] sm:$0xff]  ;;  %v1502_v15 = vmov 0.0   ;;  %v318_v20 = vld [vmem:[%s251_s27 + $0x10] sm:$0xff]  ;;  %vm365_vm5 = vcmask 1043456  }
  0x24   : > { %s290_s11 = scalar_select %p289_p11, %s1484_s14, 1  ;;  %v342_v10 = vmul.f32 %v316_v8, %v316_v8  ;;  %v343_v14 = vmul.f32 %v317_v11, %v317_v11  ;;  %v344_v23 = vmul.f32 %v318_v20, %v318_v20  ;;  %v320_v27 = vld [vmem:[%s251_s27 + $0x20] sm:$0xf]  ;;  %v319_v28 = vld [vmem:[%s251_s27 + $0x18] sm:$0xff]  ;;  %v1503_v40 = vmov 0  }
  0x25   : > { %v1592_v6 = vshrl.u32 %v322_v5, 7  ;;  %s1376_s21 = sshll.u32 %s288_s10, 1  ;;  %v345_v29 = vmul.f32 %v319_v28, %v319_v28  ;;  %v346_v32 = vmul.f32 %v320_v27, %v320_v27  ;;  %1444 = vset.pattern.permute.xlu0 %v1503_v40  ;;  %1445 = vset.pattern.permute.xlu1 %v1503_v40  ;;  %v1504_v41 = vmov 1966171168   ;;  %s1882_s28 = smov (!%p297_p12, %s296_s28), 3 }
  0x26   : > { %s292_s22 = sadd.s32 %s1376_s21, %s290_s11  ;;  %v535_v42 = vunpack.c.l.s4 %v1504_v41  ;;  %s1813_s29 = scalar_lea.vmem %s1868_s3, %s1882_s28  ;;  %vm313_vm6 = vcmask 286720   ;;  %vm776_vm7 = vcmask 130112   ;;  %vm783_vm8 = vcmask 195712  }
  0x27   : > { %v324_v7 = vadd.s32 8, %v1592_v6  ;;  %s293_s26 = scalar_lea.vmem %s1866_s1, %s292_s22  ;;  %v325_v12 = vadd.s32 16, %v1592_v6  ;;  %v326_v21 = vadd.s32 24, %v1592_v6  ;;  %v327_v22 = vadd.s32 32, %v1592_v6  ;;  %315 = vst.msk [vmem:[%s1813_s29] sm:$0x1] %vm313_vm6, %v1502_v15  ;;  %s1822_s5 = scalar_lea.vmem %s1867_s2, %s1882_s28 }
  0x28   : > { %v1379_v9 = vld [vmem:[%s293_s26] ss:$0 sm:$0xff]  ;;  %v536_v43 = vunpack.c.0.s8 %v535_v42  ;;  %v1609_v44 = vsub.s32 0, %v1592_v6  ;;  %v1612_v45 = vsub.s32 1, %v1592_v6  ;;  %v1615_v46 = vsub.s32 2, %v1592_v6 }
  0x29   : > { %vm332_vm0 = vcmp.eq.s32.totalorder %v1592_v6, %v1379_v9  ;;  %vm333_vm1 = vcmp.eq.s32.totalorder %v324_v7, %v1379_v9  ;;  %vm334_vm2 = vcmp.eq.s32.totalorder %v325_v12, %v1379_v9  ;;  %vm335_vm3 = vcmp.eq.s32.totalorder %v326_v21, %v1379_v9  ;;  %314 = vst.msk [vmem:[%s1822_s5] sm:$0x1] %vm313_vm6, %v1502_v15 }
  0x2a   : > { %v337_v13 = vsel %vm332_vm0, %v316_v8, 0.0  ;;  %v347_v16 = vsel %vm332_vm0, 1.0, %v1502_v15  ;;  %v348_v17 = vsel %vm333_vm1, 1.0, %v1502_v15  ;;  %v338_v18 = vsel %vm333_vm1, %v317_v11, 0.0 }
  0x2b   : > { %357 = vadd.xlane.f32.xlu0 %v337_v13  ;;  %v352_v19 = vadd.f32 %v347_v16, %v342_v10  ;;  %v353_v24 = vadd.f32 %v348_v17, %v343_v14  ;;  %v349_v25 = vsel %vm334_vm2, 1.0, %v1502_v15  ;;  %v339_v26 = vsel %vm334_vm2, %v318_v20, 0.0 }
  0x2c   : > { %vm336_vm4 = vcmp.eq.s32.totalorder %v327_v22, %v1379_v9  ;;  %v354_v30 = vadd.f32 %v349_v25, %v344_v23  ;;  %v350_v31 = vsel %vm335_vm3, 1.0, %v1502_v15  ;;  %v340_v33 = vsel %vm335_vm3, %v319_v28, 0.0 }
  0x2d   : > { %369 = vadd.xlane.f32.xlu1 %v352_v19  ;;  %v351_v34 = vsel %vm336_vm4, 1.0, %v1502_v15  ;;  %v341_v35 = vsel %vm336_vm4, %v320_v27, 0.0  ;;  %v355_v36 = vadd.f32 %v350_v31, %v345_v29  ;;  %v1618_v47 = vsub.s32 3, %v1592_v6 }
  0x2e   : > { %v356_v37 = vadd.f32 %v351_v34, %v346_v32  ;;  %v366_v38 = vsel %vm365_vm5, %v341_v35, 0.0  ;;  %v1621_v48 = vsub.s32 4, %v1592_v6  ;;  %v1624_v49 = vsub.s32 5, %v1592_v6 }
  0x2f   : > { %359 = vadd.xlane.f32.xlu0 %v338_v18  ;;  %v1627_v50 = vsub.s32 6, %v1592_v6  ;;  %v1630_v51 = vsub.s32 7, %v1592_v6  ;;  %v1633_v52 = vsub.s32 %v536_v43, %v1592_v6  ;;  %vm797_vm9 = vcmask 326912  }
  0x30   : > { %v377_v39 = vsel %vm365_vm5, %v356_v37, 0.0  ;;  %vm790_vm10 = vcmask 261312  }
  0x31   : > { %371 = vadd.xlane.f32.xlu1 %v353_v24 }
  0x33   : > { %361 = vadd.xlane.f32.xlu0 %v339_v26 }
  0x35   : > { %373 = vadd.xlane.f32.xlu1 %v354_v30 }
  0x37   : > { %363 = vadd.xlane.f32.xlu0 %v340_v33 }
  0x39   : > { %375 = vadd.xlane.f32.xlu1 %v355_v36 }
  0x3b   : > { %367 = vadd.xlane.f32.xlu0 %v366_v38 }
  0x3d   : > { %378 = vadd.xlane.f32.xlu1 %v377_v39 }
  0xb4   : > { %v358_v53 = vpop.xlane.xlu0 %357 }
  0xb5   : > { %v389_v54 = vrot.slane %v358_v53, %v1609_v44  ;;  %v393_v55 = vrot.slane %v358_v53, %v1612_v45  ;;  %v397_v56 = vrot.slane %v358_v53, %v1615_v46  ;;  %v401_v57 = vrot.slane %v358_v53, %v1618_v47 }
  0xb6   : > { %v405_v58 = vrot.slane %v358_v53, %v1621_v48  ;;  %v409_v59 = vrot.slane %v358_v53, %v1624_v49  ;;  %v413_v60 = vrot.slane %v358_v53, %v1627_v50  ;;  %v417_v61 = vrot.slane %v358_v53, %v1630_v51  ;;  %v1643_v0 = vpop.xlane.xlu1 %369 }
  0xb7   : > { %v530_v62 = vcombine.low %v389_v54, %v393_v55  ;;  %v531_v63 = vcombine.low %v397_v56, %v401_v57  ;;  %v826_v4 = vrot.slane %v1643_v0, %v1609_v44  ;;  %v830_v7 = vrot.slane %v1643_v0, %v1612_v45 }
  0xb8   : > { %v360_v1 = vpop.xlane.xlu0 %359  ;;  %v532_v2 = vcombine.low %v405_v58, %v409_v59  ;;  %v533_v3 = vcombine.low %v413_v60, %v417_v61 }
  0xb9   : > { %v540_v8 = vrot.slane %v530_v62, %v1633_v52  ;;  %v547_v9 = vrot.slane %v531_v63, %v1633_v52  ;;  %v421_v10 = vrot.slane %v360_v1, %v1609_v44  ;;  %v425_v11 = vrot.slane %v360_v1, %v1612_v45 }
  0xba   : > { %v554_v12 = vrot.slane %v532_v2, %v1633_v52  ;;  %v561_v13 = vrot.slane %v533_v3, %v1633_v52  ;;  %v429_v14 = vrot.slane %v360_v1, %v1615_v46  ;;  %v433_v16 = vrot.slane %v360_v1, %v1618_v47  ;;  %v1660_v21 = vpop.xlane.xlu1 %371 }
  0xbb   : > { %v562_v17 = vcombine.low %v540_v8, %v547_v9  ;;  %v437_v18 = vrot.slane %v360_v1, %v1621_v48  ;;  %v441_v19 = vrot.slane %v360_v1, %v1624_v49  ;;  %v445_v20 = vrot.slane %v360_v1, %v1627_v50 }
  0xbc   : > { %v362_v22 = vpop.xlane.xlu0 %361  ;;  %v563_v23 = vcombine.low %v554_v12, %v561_v13  ;;  %v449_v24 = vrot.slane %v360_v1, %v1630_v51  ;;  %v579_v25 = vcombine.low %v421_v10, %v425_v11  ;;  %v580_v26 = vcombine.low %v429_v14, %v433_v16 }
  0xbd   : > { %v570_v27 = vrot.slane %v562_v17, %v1633_v52  ;;  %v581_v28 = vcombine.low %v437_v18, %v441_v19  ;;  %v453_v29 = vrot.slane %v362_v22, %v1609_v44  ;;  %v457_v30 = vrot.slane %v362_v22, %v1612_v45 }
  0xbe   : > { %v577_v31 = vrot.slane %v563_v23, %v1633_v52  ;;  %v582_v32 = vcombine.low %v445_v20, %v449_v24  ;;  %v589_v33 = vrot.slane %v579_v25, %v1633_v52  ;;  %v596_v34 = vrot.slane %v580_v26, %v1633_v52  ;;  %v1673_v39 = vpop.xlane.xlu1 %373 }
  0xbf   : > { %v603_v35 = vrot.slane %v581_v28, %v1633_v52  ;;  %v461_v36 = vrot.slane %v362_v22, %v1615_v46  ;;  %v465_v37 = vrot.slane %v362_v22, %v1618_v47  ;;  %v469_v38 = vrot.slane %v362_v22, %v1621_v48 }
  0xc0   : > { %v364_v40 = vpop.xlane.xlu0 %363  ;;  %v578_v41 = vcombine.low %v570_v27, %v577_v31  ;;  %v610_v42 = vrot.slane %v582_v32, %v1633_v52  ;;  %v611_v43 = vcombine.low %v589_v33, %v596_v34  ;;  %v473_v53 = vrot.slane %v362_v22, %v1624_v49 }
  0xc1   : > { %v477_v54 = vrot.slane %v362_v22, %v1627_v50  ;;  %v481_v55 = vrot.slane %v362_v22, %v1630_v51  ;;  %v628_v56 = vcombine.low %v453_v29, %v457_v30  ;;  %v629_v57 = vcombine.low %v461_v36, %v465_v37 }
  0xc2   : > { %751 = vperm.xlu0 %1444, %v578_v41   ;;  %v612_v58 = vcombine.low %v603_v35, %v610_v42  ;;  %v619_v59 = vrot.slane %v611_v43, %v1633_v52  ;;  %v630_v60 = vcombine.low %v469_v38, %v473_v53  ;;  %v485_v61 = vrot.slane %v364_v40, %v1609_v44  ;;  %v1684_v3 = vpop.xlane.xlu1 %375 }
  0xc3   : > { %v631_v62 = vcombine.low %v477_v54, %v481_v55  ;;  %v638_v63 = vrot.slane %v628_v56, %v1633_v52  ;;  %v645_v1 = vrot.slane %v629_v57, %v1633_v52  ;;  %v489_v2 = vrot.slane %v364_v40, %v1612_v45 }
  0xc4   : > { %v626_v8 = vrot.slane %v612_v58, %v1633_v52  ;;  %v652_v9 = vrot.slane %v630_v60, %v1633_v52  ;;  %v493_v10 = vrot.slane %v364_v40, %v1615_v46  ;;  %v497_v11 = vrot.slane %v364_v40, %v1618_v47 }
  0xc5   : > { %v659_v12 = vrot.slane %v631_v62, %v1633_v52  ;;  %v660_v13 = vcombine.low %v638_v63, %v645_v1  ;;  %v501_v14 = vrot.slane %v364_v40, %v1621_v48  ;;  %v505_v16 = vrot.slane %v364_v40, %v1624_v49 }
  0xc6   : > { %v627_v17 = vcombine.low %v619_v59, %v626_v8  ;;  %v509_v18 = vrot.slane %v364_v40, %v1627_v50  ;;  %v513_v19 = vrot.slane %v364_v40, %v1630_v51  ;;  %v677_v20 = vcombine.low %v485_v61, %v489_v2  ;;  %v379_v34 = vpop.xlane.xlu1 %378 }
  0xc7   : > { %v661_v22 = vcombine.low %v652_v9, %v659_v12  ;;  %v668_v23 = vrot.slane %v660_v13, %v1633_v52  ;;  %v678_v24 = vcombine.low %v493_v10, %v497_v11  ;;  %v679_v25 = vcombine.low %v501_v14, %v505_v16  ;;  %v368_v12 = vpop.xlane.xlu0 %367 }
  0xc8   : > { %754 = vperm.xlu1 %1445, %v627_v17   ;;  %v680_v26 = vcombine.low %v509_v18, %v513_v19  ;;  %v687_v27 = vrot.slane %v677_v20, %v1633_v52  ;;  %v834_v28 = vrot.slane %v1643_v0, %v1615_v46  ;;  %v838_v29 = vrot.slane %v1643_v0, %v1618_v47 }
  0xc9   : > { %v675_v30 = vrot.slane %v661_v22, %v1633_v52  ;;  %v694_v31 = vrot.slane %v678_v24, %v1633_v52  ;;  %v701_v32 = vrot.slane %v679_v25, %v1633_v52  ;;  %v842_v33 = vrot.slane %v1643_v0, %v1621_v48 }
  0xca   : > { %v708_v35 = vrot.slane %v680_v26, %v1633_v52  ;;  %v846_v36 = vrot.slane %v1643_v0, %v1624_v49  ;;  %v850_v37 = vrot.slane %v1643_v0, %v1627_v50  ;;  %v854_v38 = vrot.slane %v1643_v0, %v1630_v51 }
  0xcb   : > { %v676_v40 = vcombine.low %v668_v23, %v675_v30  ;;  %v709_v41 = vcombine.low %v687_v27, %v694_v31  ;;  %v967_v42 = vcombine.low %v826_v4, %v830_v7  ;;  %v968_v43 = vcombine.low %v834_v28, %v838_v29 }
  0xcc   : > { %v710_v53 = vcombine.low %v701_v32, %v708_v35  ;;  %v969_v54 = vcombine.low %v842_v33, %v846_v36  ;;  %v970_v55 = vcombine.low %v850_v37, %v854_v38  ;;  %v954_v56 = vrot.slane %v379_v34, %v1609_v44 }
  0xcd   : > { %757 = vperm.xlu1 %1445, %v676_v40   ;;  %v717_v57 = vrot.slane %v709_v41, %v1633_v52  ;;  %v977_v58 = vrot.slane %v967_v42, %v1633_v52  ;;  %v984_v59 = vrot.slane %v968_v43, %v1633_v52  ;;  %v958_v60 = vrot.slane %v379_v34, %v1612_v45 }
  0xce   : > { %v724_v61 = vrot.slane %v710_v53, %v1633_v52  ;;  %v991_v0 = vrot.slane %v969_v54, %v1633_v52  ;;  %v998_v4 = vrot.slane %v970_v55, %v1633_v52  ;;  %v962_v7 = vrot.slane %v379_v34, %v1615_v46 }
  0xcf   : > { %v999_v62 = vcombine.low %v977_v58, %v984_v59  ;;  %v966_v63 = vrot.slane %v379_v34, %v1618_v47  ;;  %v1163_v1 = vcombine.low %v954_v56, %v958_v60  ;;  %v858_v2 = vrot.slane %v1660_v21, %v1609_v44 }
  0xd0   : > { %v725_v8 = vcombine.low %v717_v57, %v724_v61  ;;  %v1000_v9 = vcombine.low %v991_v0, %v998_v4  ;;  %v862_v10 = vrot.slane %v1660_v21, %v1612_v45  ;;  %v866_v11 = vrot.slane %v1660_v21, %v1615_v46 }
  0xd1   : > { %v1007_v13 = vrot.slane %v999_v62, %v1633_v52  ;;  %v1164_v14 = vcombine.low %v962_v7, %v966_v63  ;;  %v870_v16 = vrot.slane %v1660_v21, %v1618_v47  ;;  %v874_v17 = vrot.slane %v1660_v21, %v1621_v48 }
  0xd2   : > { %760 = vperm.xlu1 %1445, %v725_v8   ;;  %v1014_v18 = vrot.slane %v1000_v9, %v1633_v52  ;;  %v878_v19 = vrot.slane %v1660_v21, %v1624_v49  ;;  %v882_v20 = vrot.slane %v1660_v21, %v1627_v50  ;;  %v886_v22 = vrot.slane %v1660_v21, %v1630_v51 }
  0xd3   : > { %v1016_v23 = vcombine.low %v858_v2, %v862_v10  ;;  %v1017_v24 = vcombine.low %v866_v11, %v870_v16  ;;  %v517_v25 = vrot.slane %v368_v12, %v1609_v44  ;;  %v521_v26 = vrot.slane %v368_v12, %v1612_v45 }
  0xd4   : > { %v1015_v27 = vcombine.low %v1007_v13, %v1014_v18  ;;  %v1018_v28 = vcombine.low %v874_v17, %v878_v19  ;;  %v1019_v29 = vcombine.low %v882_v20, %v886_v22  ;;  %v525_v30 = vrot.slane %v368_v12, %v1615_v46 }
  0xd5   : > { %v1026_v31 = vrot.slane %v1016_v23, %v1633_v52  ;;  %v1033_v32 = vrot.slane %v1017_v24, %v1633_v52  ;;  %v529_v33 = vrot.slane %v368_v12, %v1618_v47  ;;  %v1753_v34 = vcombine.low %v517_v25, %v521_v26 }
  0xd6   : > { %1188 = vperm.xlu1 %1445, %v1015_v27   ;;  %v1040_v21 = vrot.slane %v1018_v28, %v1633_v52  ;;  %v1047_v35 = vrot.slane %v1019_v29, %v1633_v52  ;;  %v890_v36 = vrot.slane %v1673_v39, %v1609_v44  ;;  %v894_v37 = vrot.slane %v1673_v39, %v1612_v45 }
  0xd7   : > { %v1048_v38 = vcombine.low %v1026_v31, %v1033_v32  ;;  %v727_v40 = vcombine.low %v525_v30, %v529_v33  ;;  %v898_v41 = vrot.slane %v1673_v39, %v1615_v46  ;;  %v902_v42 = vrot.slane %v1673_v39, %v1618_v47 }
  0xd8   : > { %v1049_v43 = vcombine.low %v1040_v21, %v1047_v35  ;;  %v906_v53 = vrot.slane %v1673_v39, %v1621_v48  ;;  %v910_v54 = vrot.slane %v1673_v39, %v1624_v49  ;;  %v914_v55 = vrot.slane %v1673_v39, %v1627_v50 }
  0xd9   : > { %v1056_v56 = vrot.slane %v1048_v38, %v1633_v52  ;;  %v918_v57 = vrot.slane %v1673_v39, %v1630_v51  ;;  %v1065_v58 = vcombine.low %v890_v36, %v894_v37  ;;  %v1066_v59 = vcombine.low %v898_v41, %v902_v42 }
  0xda   : > { %v1063_v60 = vrot.slane %v1049_v43, %v1633_v52  ;;  %v1067_v61 = vcombine.low %v906_v53, %v910_v54  ;;  %v1171_v0 = vrot.slane %v1163_v1, %v1633_v52  ;;  %v1178_v4 = vrot.slane %v1164_v14, %v1633_v52 }
  0xdb   : > { %v1068_v7 = vcombine.low %v914_v55, %v918_v57  ;;  %v1075_v62 = vrot.slane %v1065_v58, %v1633_v52  ;;  %v1082_v63 = vrot.slane %v1066_v59, %v1633_v52  ;;  %v922_v2 = vrot.slane %v1684_v3, %v1609_v44 }
  0xdc   : > { %v1064_v8 = vcombine.low %v1056_v56, %v1063_v60  ;;  %v1089_v39 = vrot.slane %v1067_v61, %v1633_v52  ;;  %v1179_v9 = vcombine.low %v1171_v0, %v1178_v4  ;;  %v926_v10 = vrot.slane %v1684_v3, %v1612_v45 }
  0xdd   : > { %v1096_v11 = vrot.slane %v1068_v7, %v1633_v52  ;;  %v1097_v1 = vcombine.low %v1075_v62, %v1082_v63  ;;  %v930_v12 = vrot.slane %v1684_v3, %v1615_v46  ;;  %v934_v13 = vrot.slane %v1684_v3, %v1618_v47 }
  0xde   : > { %1191 = vperm.xlu1 %1445, %v1064_v8   ;;  %v1186_v44 = vrot.slane %v1179_v9, %v1633_v52  ;;  %v938_v14 = vrot.slane %v1684_v3, %v1621_v48  ;;  %v942_v45 = vrot.slane %v1684_v3, %v1624_v49  ;;  %v946_v16 = vrot.slane %v1684_v3, %v1627_v50 }
  0xdf   : > { %v1098_v17 = vcombine.low %v1089_v39, %v1096_v11  ;;  %v1105_v18 = vrot.slane %v1097_v1, %v1633_v52  ;;  %v950_v46 = vrot.slane %v1684_v3, %v1630_v51  ;;  %v1114_v47 = vcombine.low %v922_v2, %v926_v10 }
  0xe0   : > { %1200 = vperm.xlu0 %1444, %v1186_v44   ;;  %v1115_v19 = vcombine.low %v930_v12, %v934_v13  ;;  %v1116_v20 = vcombine.low %v938_v14, %v942_v45  ;;  %v734_v51 = vrot.slane %v1753_v34, %v1633_v52  ;;  %v741_v3 = vrot.slane %v727_v40, %v1633_v52  ;;  %v817_v14 = vld [vmem:[%s1813_s29] sm:$0x1] }
  0xe1   : > { %v1112_v22 = vrot.slane %v1098_v17, %v1633_v52  ;;  %v1117_v48 = vcombine.low %v946_v16, %v950_v46  ;;  %v1124_v23 = vrot.slane %v1114_v47, %v1633_v52  ;;  %v766_v37 = vand.u32 127, %v322_v5  ;;  %v380_v46 = vld [vmem:[%s1822_s5] sm:$0x1] }
  0xe2   : > { %v1131_v49 = vrot.slane %v1115_v19, %v1633_v52  ;;  %v1138_v50 = vrot.slane %v1116_v20, %v1633_v52  ;;  %v742_v30 = vcombine.low %v734_v51, %v741_v3 }
  0xe3   : > { %v1113_v24 = vcombine.low %v1105_v18, %v1112_v22  ;;  %v1145_v25 = vrot.slane %v1117_v48, %v1633_v52  ;;  %v771_v38 = vadd.s32 4294967288, %v766_v37  ;;  %v778_v40 = vadd.s32 4294967280, %v766_v37 }
  0xe4   : > { %v1146_v26 = vcombine.low %v1124_v23, %v1131_v49  ;;  %v749_v32 = vrot.slane %v742_v30, %v1633_v52  ;;  %v792_v41 = vadd.s32 4294967264, %v766_v37  ;;  %v785_v43 = vadd.s32 4294967272, %v766_v37 }
  0xe5   : > { %1194 = vperm.xlu1 %1445, %v1113_v24   ;;  %v1147_v27 = vcombine.low %v1138_v50, %v1145_v25  ;;  %v774_v54 = vsub.s32 %v771_v38, %v1592_v6  ;;  %v781_v15 = vsub.s32 %v778_v40, %v1592_v6  ;;  %v769_v56 = vsub.s32 %v766_v37, %v1592_v6 }
  0xe6   : > { %v1154_v28 = vrot.slane %v1146_v26, %v1633_v52  ;;  %v795_v55 = vsub.s32 %v792_v41, %v1592_v6  ;;  %v788_v59 = vsub.s32 %v785_v43, %v1592_v6 }
  0xe7   : > { %v1161_v29 = vrot.slane %v1147_v27, %v1633_v52 }
  0xe9   : > { %v1162_v31 = vcombine.low %v1154_v28, %v1161_v29 }
  0xeb   : > { %1197 = vperm.xlu1 %1445, %v1162_v31  }
  0xef   : > { %763 = vperm.xlu1 %1445, %v749_v32  }
 0x13d   : > { %v752_v42 = vpop.permute.xlu0 %751 }
 0x13e   : > { %v770_v2 = vrot.slane %v752_v42, %v769_v56 }
 0x143   : > { %v755_v33 = vpop.permute.xlu1 %754 }
 0x144   : > { %v775_v61 = vrot.slane %v755_v33, %v774_v54 }
 0x146   : > { %v777_v6 = vsel %vm776_vm7, %v775_v61, %v770_v2 }
 0x148   : > { %v758_v34 = vpop.permute.xlu1 %757 }
 0x149   : > { %v782_v7 = vrot.slane %v758_v34, %v781_v15 }
 0x14b   : > { %v784_v1 = vsel %vm783_vm8, %v782_v7, %v777_v6 }
 0x14d   : > { %v761_v21 = vpop.permute.xlu1 %760 }
 0x14e   : > { %v789_v8 = vrot.slane %v761_v21, %v788_v59 }
 0x150   : > { %v791_v44 = vsel %vm790_vm10, %v789_v8, %v784_v1 }
 0x151   : > { %v1189_v35 = vpop.permute.xlu1 %1188 }
 0x152   : > { %v1205_v5 = vrot.slane %v1189_v35, %v769_v56 }
 0x159   : > { %v1192_v36 = vpop.permute.xlu1 %1191 }
 0x15a   : > { %v1209_v57 = vrot.slane %v1192_v36, %v774_v54 }
 0x15b   : > { %v1201_v58 = vpop.permute.xlu0 %1200 }
 0x15c   : > { %v1224_v4 = vrot.slane %v1201_v58, %v795_v55  ;;  %v1210_v62 = vsel %vm776_vm7, %v1209_v57, %v1205_v5 }
 0x160   : > { %v1195_v53 = vpop.permute.xlu1 %1194 }
 0x161   : > { %v1214_v60 = vrot.slane %v1195_v53, %v781_v15 }
 0x163   : > { %v1215_v39 = vsel %vm783_vm8, %v1214_v60, %v1210_v62 }
 0x166   : > { %v1198_v0 = vpop.permute.xlu1 %1197 }
 0x167   : > { %v1219_v63 = vrot.slane %v1198_v0, %v788_v59 }
 0x169   : > { %v1220_v9 = vsel %vm790_vm10, %v1219_v63, %v1215_v39 }
 0x16a   : > { %v1225_v10 = vsel %vm797_vm9, %v1224_v4, %v1220_v9  ;;  %v764_v11 = vpop.permute.xlu1 %763 }
 0x16b   : > { %v1232_v12 = vrot.slane %v1225_v10, %v1633_v52  ;;  %v796_v13 = vrot.slane %v764_v11, %v795_v55 }
 0x16d   : > { %v1239_v45 = vrot.slane %v1232_v12, %v1633_v52  ;;  %v798_v16 = vsel %vm797_vm9, %v796_v13, %v791_v44 }
 0x16e   : > { %v805_v17 = vrot.slane %v798_v16, %v1633_v52 }
 0x16f   : > { %v1241_v18 = vadd.f32 %v1239_v45, %v817_v14 }
 0x170   : > { %v812_v47 = vrot.slane %v805_v17, %v1633_v52 }
 0x171   : > { %1242 = vst.msk [vmem:[%s1813_s29] sm:$0x1] %vm313_vm6, %v1241_v18 }
 0x172   : > { %v814_v19 = vadd.f32 %v812_v47, %v380_v46 }
 0x174   : > { %816 = vst.msk [vmem:[%s1822_s5] sm:$0x1] %vm313_vm6, %v814_v19 }
 0x175 PF: > { %s14_s18 = sadd.s32 1, %s1500_s18   ;;  %s1869_s12 = smov %s1480_s13 }
 0x176   : > { %p11_p13 = scmp.ge.s32.totalorder %s14_s18, 6   ;;  %s1870_s13 = smov %s1576_s25 }
 0x177   : > { %s1871_s14 = smov %s1492_s16  ;;  %s1872_s15 = smov %s1496_s17 }
 0x178   : > { %s1873_s16 = smov %s1876_s19  ;;  %s1874_s17 = smov %s1880_s20 }
 0x179   :  { %13 = sbr.rel (!%p11_p13) target bundleno = 4 (0x4), region = 120 }

</bundles_post_ra>
